<compile_context>
chip_gen: v6e
topology: v6e:2x2x1
jax: 0.10.0
libtpu: 0.0.40
codegen_flags: <defaults>
</compile_context>

<pallas_src>
import jax
import jax.numpy as jnp
from jax.experimental import pallas as pl
from jax.experimental.pallas import tpu as pltpu

HIDDEN = 250      # logical hidden width of the PyTorch module
LANE = 128
SUBLANE = 8


def _round_up(v, m):
    return ((v + m - 1) // m) * m


def _mlp_kernel(x_ref,
                w1, b1, w2, b2, w3, b3, w4, b4, w5, b5, w6, b6,
                o_ref):
    """Fused 6-layer MLP: relu(x@W+b) x5 -> x@W6+b6 (no relu on the last layer).

    Weights are bf16 MXU operands; accumulation, bias add and ReLU are f32.
    """
    h = x_ref[...].astype(jnp.float32)

    def linear(h_f32, w_ref, b_ref, relu):
        y = jnp.dot(h_f32.astype(jnp.bfloat16), w_ref[...],
                    preferred_element_type=jnp.float32)
        y = y + b_ref[...]            # (1, out) f32 bias broadcasts over batch rows
        if relu:
            y = jnp.maximum(y, 0.0)
        return y

    h = linear(h, w1, b1, relu=True)
    h = linear(h, w2, b2, relu=True)
    h = linear(h, w3, b3, relu=True)
    h = linear(h, w4, b4, relu=True)
    h = linear(h, w5, b5, relu=True)
    h = linear(h, w6, b6, relu=False)

    o_ref[...] = h.astype(o_ref.dtype)


def dynamic_model_forward(x, params, *, batch_tile=None):
    """Run the fused MLP kernel.

    x: (B, input_size) float32
    params: list of 6 (W, b) with W shaped (in, out) [transposed vs torch], b shaped (out,)
    """
    B, in_size = x.shape
    out_size = params[-1][0].shape[1]

    # ---- pad feature dims to lane-aligned sizes (zero-filled, so math is unchanged) ----
    dims = [in_size] + [w.shape[1] for w, _ in params]
    dims_pad = [_round_up(d, LANE) for d in dims]
    in_pad, out_pad = dims_pad[0], dims_pad[-1]

    flat = []
    for li, (w, b) in enumerate(params):
        di, do = dims_pad[li], dims_pad[li + 1]
        w_p = jnp.zeros((di, do), jnp.bfloat16)
        w_p = w_p.at[: w.shape[0], : w.shape[1]].set(w.astype(jnp.bfloat16))
        b_p = jnp.zeros((1, do), jnp.float32)
        b_p = b_p.at[0, : b.shape[0]].set(b.astype(jnp.float32))
        flat.append(w_p)
        flat.append(b_p)

    # ---- batch tiling: multiple of 8, <=512, >=2 grid steps when batch allows ----
    if batch_tile is None:
        b8 = _round_up(B, SUBLANE)
        if b8 >= 2 * SUBLANE:
            batch_tile = min(512, _round_up(-(-b8 // 2), SUBLANE))
        else:
            batch_tile = b8
    assert batch_tile % SUBLANE == 0, "batch_tile must be a multiple of 8"
    B_pad = _round_up(B, batch_tile)

    x_p = jnp.zeros((B_pad, in_pad), jnp.float32)
    x_p = x_p.at[:B, :in_size].set(x.astype(jnp.float32))

    grid = (B_pad // batch_tile,)

    # Full-array blocks for every weight/bias (same block every grid step).
    param_specs = [pl.BlockSpec(p.shape, lambda i: (0, 0)) for p in flat]
    in_specs = [pl.BlockSpec((batch_tile, in_pad), lambda i: (i, 0))] + param_specs
    out_specs = pl.BlockSpec((batch_tile, out_pad), lambda i: (i, 0))

    out_padded = pl.pallas_call(
        _mlp_kernel,
        out_shape=jax.ShapeDtypeStruct((B_pad, out_pad), jnp.float32),
        grid_spec=pltpu.PrefetchScalarGridSpec(
            num_scalar_prefetch=0,
            grid=grid,
            in_specs=in_specs,
            out_specs=out_specs,
        ),
        compiler_params=pltpu.CompilerParams(
            dimension_semantics=("parallel",),
        ),
    )(x_p, *flat)

    # Slice the real batch rows and output columns back out (padding is exact zeros).
    return out_padded[:B, :out_size]


def init_params(key, input_size, output_size):
    """Deterministic init mimicking PyTorch nn.Linear default (uniform +-1/sqrt(fan_in)).

    Weights returned as (in_features, out_features) — transposed vs. torch storage.
    """
    dims = [input_size, HIDDEN, HIDDEN, HIDDEN, HIDDEN, HIDDEN, output_size]
    params = []
    for li in range(6):
        fan_in, fan_out = dims[li], dims[li + 1]
        key, kw, kb = jax.random.split(key, 3)
        bound = 1.0 / jnp.sqrt(jnp.float32(fan_in))
        w = jax.random.uniform(kw, (fan_in, fan_out), jnp.float32, -bound, bound)
        b = jax.random.uniform(kb, (fan_out,), jnp.float32, -bound, bound)
        params.append((w, b))
    return params


def reference_forward(x, params):
    h = x
    for i, (w, b) in enumerate(params):
        h = h @ w + b
        if i < 5:
            h = jnp.maximum(h, 0.0)
    return h


if __name__ == "__main__":
    key = jax.random.PRNGKey(0)
    input_size = 32
    output_size = 8
    batch = 16   # small, but >=16 so the grid gets 2 steps (exercises tiling/megacore path)

    kx, kp = jax.random.split(key)
    x = jax.random.normal(kx, (batch, input_size), jnp.float32)
    params = init_params(kp, input_size, output_size)

    out = dynamic_model_forward(x, params)
    out = jax.block_until_ready(out)

    ref = reference_forward(x, params)
    assert out.shape == (batch, output_size)
    # bf16 matmul operands with f32 accumulation -> slightly looser tolerance vs f32 ref.
    assert jnp.allclose(out, ref, atol=2e-2, rtol=2e-2), "mismatch vs pure-JAX reference"

    print("KERNEL_OK")
</pallas_src>

<mosaic_0001>
module attributes {stable_mosaic.version = 11 : i64} {
  func.func @_mlp_kernel(%arg0: i32, %arg1: memref<8x128xf32, #tpu.memory_space<vmem>>, %arg2: memref<128x256xbf16, #tpu.memory_space<vmem>>, %arg3: memref<1x256xf32, #tpu.memory_space<vmem>>, %arg4: memref<256x256xbf16, #tpu.memory_space<vmem>>, %arg5: memref<1x256xf32, #tpu.memory_space<vmem>>, %arg6: memref<256x256xbf16, #tpu.memory_space<vmem>>, %arg7: memref<1x256xf32, #tpu.memory_space<vmem>>, %arg8: memref<256x256xbf16, #tpu.memory_space<vmem>>, %arg9: memref<1x256xf32, #tpu.memory_space<vmem>>, %arg10: memref<256x256xbf16, #tpu.memory_space<vmem>>, %arg11: memref<1x256xf32, #tpu.memory_space<vmem>>, %arg12: memref<256x128xbf16, #tpu.memory_space<vmem>>, %arg13: memref<1x128xf32, #tpu.memory_space<vmem>>, %arg14: memref<8x128xf32, #tpu.memory_space<vmem>>) attributes {dimension_semantics = [#tpu.dimension_semantics<parallel>], iteration_bounds = array<i64: 2>, scalar_prefetch = 0 : i64, scratch_operands = 0 : i64, tpu.core_type = #tpu.core_type<tc>, window_params = [{transform_indices = @transform_0, window_bounds = array<i64: 8, 128>}, {pipeline_mode = #tpu.pipeline_mode<synchronous>, transform_indices = @transform_1, window_bounds = array<i64: 128, 256>}, {pipeline_mode = #tpu.pipeline_mode<synchronous>, transform_indices = @transform_2, window_bounds = array<i64: 1, 256>}, {pipeline_mode = #tpu.pipeline_mode<synchronous>, transform_indices = @transform_3, window_bounds = array<i64: 256, 256>}, {pipeline_mode = #tpu.pipeline_mode<synchronous>, transform_indices = @transform_4, window_bounds = array<i64: 1, 256>}, {pipeline_mode = #tpu.pipeline_mode<synchronous>, transform_indices = @transform_5, window_bounds = array<i64: 256, 256>}, {pipeline_mode = #tpu.pipeline_mode<synchronous>, transform_indices = @transform_6, window_bounds = array<i64: 1, 256>}, {pipeline_mode = #tpu.pipeline_mode<synchronous>, transform_indices = @transform_7, window_bounds = array<i64: 256, 256>}, {pipeline_mode = #tpu.pipeline_mode<synchronous>, transform_indices = @transform_8, window_bounds = array<i64: 1, 256>}, {pipeline_mode = #tpu.pipeline_mode<synchronous>, transform_indices = @transform_9, window_bounds = array<i64: 256, 256>}, {pipeline_mode = #tpu.pipeline_mode<synchronous>, transform_indices = @transform_10, window_bounds = array<i64: 1, 256>}, {pipeline_mode = #tpu.pipeline_mode<synchronous>, transform_indices = @transform_11, window_bounds = array<i64: 256, 128>}, {pipeline_mode = #tpu.pipeline_mode<synchronous>, transform_indices = @transform_12, window_bounds = array<i64: 1, 128>}, {transform_indices = @transform_13, window_bounds = array<i64: 8, 128>}]} {
    %c0 = arith.constant 0 : index
    %c0_0 = arith.constant 0 : index
    %0 = vector.load %arg1[%c0, %c0_0] : memref<8x128xf32, #tpu.memory_space<vmem>>, vector<8x128xf32>
    %1 = arith.truncf %0 : vector<8x128xf32> to vector<8x128xbf16>
    %c0_1 = arith.constant 0 : index
    %c0_2 = arith.constant 0 : index
    %2 = vector.load %arg2[%c0_1, %c0_2] : memref<128x256xbf16, #tpu.memory_space<vmem>>, vector<128x256xbf16>
    %cst = arith.constant dense<0.000000e+00> : vector<8x256xf32>
    %3 = tpu.matmul %1, %2, %cst {dimension_numbers = #tpu.dot_dimension_numbers<[1], [0], [0], [1], [0, 0, 1, 1], [], []>} : vector<8x128xbf16>, vector<128x256xbf16>, vector<8x256xf32> -> vector<8x256xf32>
    %c0_3 = arith.constant 0 : index
    %c0_4 = arith.constant 0 : index
    %4 = vector.load %arg3[%c0_3, %c0_4] : memref<1x256xf32, #tpu.memory_space<vmem>>, vector<1x256xf32>
    %5 = vector.broadcast %4 : vector<1x256xf32> to vector<8x256xf32>
    %6 = arith.addf %3, %5 : vector<8x256xf32>
    %cst_5 = arith.constant 0.000000e+00 : f32
    %7 = vector.broadcast %cst_5 : f32 to vector<8x256xf32>
    %8 = arith.maximumf %6, %7 : vector<8x256xf32>
    %9 = arith.truncf %8 : vector<8x256xf32> to vector<8x256xbf16>
    %c0_6 = arith.constant 0 : index
    %c0_7 = arith.constant 0 : index
    %10 = vector.load %arg4[%c0_6, %c0_7] : memref<256x256xbf16, #tpu.memory_space<vmem>>, vector<256x256xbf16>
    %cst_8 = arith.constant dense<0.000000e+00> : vector<8x256xf32>
    %11 = tpu.matmul %9, %10, %cst_8 {dimension_numbers = #tpu.dot_dimension_numbers<[1], [0], [0], [1], [0, 0, 1, 1], [], []>} : vector<8x256xbf16>, vector<256x256xbf16>, vector<8x256xf32> -> vector<8x256xf32>
    %c0_9 = arith.constant 0 : index
    %c0_10 = arith.constant 0 : index
    %12 = vector.load %arg5[%c0_9, %c0_10] : memref<1x256xf32, #tpu.memory_space<vmem>>, vector<1x256xf32>
    %13 = vector.broadcast %12 : vector<1x256xf32> to vector<8x256xf32>
    %14 = arith.addf %11, %13 : vector<8x256xf32>
    %cst_11 = arith.constant 0.000000e+00 : f32
    %15 = vector.broadcast %cst_11 : f32 to vector<8x256xf32>
    %16 = arith.maximumf %14, %15 : vector<8x256xf32>
    %17 = arith.truncf %16 : vector<8x256xf32> to vector<8x256xbf16>
    %c0_12 = arith.constant 0 : index
    %c0_13 = arith.constant 0 : index
    %18 = vector.load %arg6[%c0_12, %c0_13] : memref<256x256xbf16, #tpu.memory_space<vmem>>, vector<256x256xbf16>
    %cst_14 = arith.constant dense<0.000000e+00> : vector<8x256xf32>
    %19 = tpu.matmul %17, %18, %cst_14 {dimension_numbers = #tpu.dot_dimension_numbers<[1], [0], [0], [1], [0, 0, 1, 1], [], []>} : vector<8x256xbf16>, vector<256x256xbf16>, vector<8x256xf32> -> vector<8x256xf32>
    %c0_15 = arith.constant 0 : index
    %c0_16 = arith.constant 0 : index
    %20 = vector.load %arg7[%c0_15, %c0_16] : memref<1x256xf32, #tpu.memory_space<vmem>>, vector<1x256xf32>
    %21 = vector.broadcast %20 : vector<1x256xf32> to vector<8x256xf32>
    %22 = arith.addf %19, %21 : vector<8x256xf32>
    %cst_17 = arith.constant 0.000000e+00 : f32
    %23 = vector.broadcast %cst_17 : f32 to vector<8x256xf32>
    %24 = arith.maximumf %22, %23 : vector<8x256xf32>
    %25 = arith.truncf %24 : vector<8x256xf32> to vector<8x256xbf16>
    %c0_18 = arith.constant 0 : index
    %c0_19 = arith.constant 0 : index
    %26 = vector.load %arg8[%c0_18, %c0_19] : memref<256x256xbf16, #tpu.memory_space<vmem>>, vector<256x256xbf16>
    %cst_20 = arith.constant dense<0.000000e+00> : vector<8x256xf32>
    %27 = tpu.matmul %25, %26, %cst_20 {dimension_numbers = #tpu.dot_dimension_numbers<[1], [0], [0], [1], [0, 0, 1, 1], [], []>} : vector<8x256xbf16>, vector<256x256xbf16>, vector<8x256xf32> -> vector<8x256xf32>
    %c0_21 = arith.constant 0 : index
    %c0_22 = arith.constant 0 : index
    %28 = vector.load %arg9[%c0_21, %c0_22] : memref<1x256xf32, #tpu.memory_space<vmem>>, vector<1x256xf32>
    %29 = vector.broadcast %28 : vector<1x256xf32> to vector<8x256xf32>
    %30 = arith.addf %27, %29 : vector<8x256xf32>
    %cst_23 = arith.constant 0.000000e+00 : f32
    %31 = vector.broadcast %cst_23 : f32 to vector<8x256xf32>
    %32 = arith.maximumf %30, %31 : vector<8x256xf32>
    %33 = arith.truncf %32 : vector<8x256xf32> to vector<8x256xbf16>
    %c0_24 = arith.constant 0 : index
    %c0_25 = arith.constant 0 : index
    %34 = vector.load %arg10[%c0_24, %c0_25] : memref<256x256xbf16, #tpu.memory_space<vmem>>, vector<256x256xbf16>
    %cst_26 = arith.constant dense<0.000000e+00> : vector<8x256xf32>
    %35 = tpu.matmul %33, %34, %cst_26 {dimension_numbers = #tpu.dot_dimension_numbers<[1], [0], [0], [1], [0, 0, 1, 1], [], []>} : vector<8x256xbf16>, vector<256x256xbf16>, vector<8x256xf32> -> vector<8x256xf32>
    %c0_27 = arith.constant 0 : index
    %c0_28 = arith.constant 0 : index
    %36 = vector.load %arg11[%c0_27, %c0_28] : memref<1x256xf32, #tpu.memory_space<vmem>>, vector<1x256xf32>
    %37 = vector.broadcast %36 : vector<1x256xf32> to vector<8x256xf32>
    %38 = arith.addf %35, %37 : vector<8x256xf32>
    %cst_29 = arith.constant 0.000000e+00 : f32
    %39 = vector.broadcast %cst_29 : f32 to vector<8x256xf32>
    %40 = arith.maximumf %38, %39 : vector<8x256xf32>
    %41 = arith.truncf %40 : vector<8x256xf32> to vector<8x256xbf16>
    %c0_30 = arith.constant 0 : index
    %c0_31 = arith.constant 0 : index
    %42 = vector.load %arg12[%c0_30, %c0_31] : memref<256x128xbf16, #tpu.memory_space<vmem>>, vector<256x128xbf16>
    %cst_32 = arith.constant dense<0.000000e+00> : vector<8x128xf32>
    %43 = tpu.matmul %41, %42, %cst_32 {dimension_numbers = #tpu.dot_dimension_numbers<[1], [0], [0], [1], [0, 0, 1, 1], [], []>} : vector<8x256xbf16>, vector<256x128xbf16>, vector<8x128xf32> -> vector<8x128xf32>
    %c0_33 = arith.constant 0 : index
    %c0_34 = arith.constant 0 : index
    %44 = vector.load %arg13[%c0_33, %c0_34] : memref<1x128xf32, #tpu.memory_space<vmem>>, vector<1x128xf32>
    %45 = vector.broadcast %44 : vector<1x128xf32> to vector<8x128xf32>
    %46 = arith.addf %43, %45 : vector<8x128xf32>
    %c0_35 = arith.constant 0 : index
    %c0_36 = arith.constant 0 : index
    %47 = vector.load %arg14[%c0_35, %c0_36] : memref<8x128xf32, #tpu.memory_space<vmem>>, vector<8x128xf32>
    tpu.vector_store %arg14[%c0_35, %c0_36], %46 {strides = array<i32>} : memref<8x128xf32, #tpu.memory_space<vmem>>, vector<8x128xf32>,
    return
  }
  func.func @transform_0(%arg0: i32) -> (i32, i32) {
    %c0_i32 = arith.constant 0 : i32
    %c0_i32_0 = arith.constant 0 : i32
    return %arg0, %c0_i32 : i32, i32
  }
  func.func @transform_1(%arg0: i32) -> (i32, i32) {
    %c0_i32 = arith.constant 0 : i32
    %c0_i32_0 = arith.constant 0 : i32
    %c0_i32_1 = arith.constant 0 : i32
    return %c0_i32, %c0_i32_0 : i32, i32
  }
  func.func @transform_2(%arg0: i32) -> (i32, i32) {
    %c0_i32 = arith.constant 0 : i32
    %c0_i32_0 = arith.constant 0 : i32
    %c0_i32_1 = arith.constant 0 : i32
    return %c0_i32, %c0_i32_0 : i32, i32
  }
  func.func @transform_3(%arg0: i32) -> (i32, i32) {
    %c0_i32 = arith.constant 0 : i32
    %c0_i32_0 = arith.constant 0 : i32
    %c0_i32_1 = arith.constant 0 : i32
    return %c0_i32, %c0_i32_0 : i32, i32
  }
  func.func @transform_4(%arg0: i32) -> (i32, i32) {
    %c0_i32 = arith.constant 0 : i32
    %c0_i32_0 = arith.constant 0 : i32
    %c0_i32_1 = arith.constant 0 : i32
    return %c0_i32, %c0_i32_0 : i32, i32
  }
  func.func @transform_5(%arg0: i32) -> (i32, i32) {
    %c0_i32 = arith.constant 0 : i32
    %c0_i32_0 = arith.constant 0 : i32
    %c0_i32_1 = arith.constant 0 : i32
    return %c0_i32, %c0_i32_0 : i32, i32
  }
  func.func @transform_6(%arg0: i32) -> (i32, i32) {
    %c0_i32 = arith.constant 0 : i32
    %c0_i32_0 = arith.constant 0 : i32
    %c0_i32_1 = arith.constant 0 : i32
    return %c0_i32, %c0_i32_0 : i32, i32
  }
  func.func @transform_7(%arg0: i32) -> (i32, i32) {
    %c0_i32 = arith.constant 0 : i32
    %c0_i32_0 = arith.constant 0 : i32
    %c0_i32_1 = arith.constant 0 : i32
    return %c0_i32, %c0_i32_0 : i32, i32
  }
  func.func @transform_8(%arg0: i32) -> (i32, i32) {
    %c0_i32 = arith.constant 0 : i32
    %c0_i32_0 = arith.constant 0 : i32
    %c0_i32_1 = arith.constant 0 : i32
    return %c0_i32, %c0_i32_0 : i32, i32
  }
  func.func @transform_9(%arg0: i32) -> (i32, i32) {
    %c0_i32 = arith.constant 0 : i32
    %c0_i32_0 = arith.constant 0 : i32
    %c0_i32_1 = arith.constant 0 : i32
    return %c0_i32, %c0_i32_0 : i32, i32
  }
  func.func @transform_10(%arg0: i32) -> (i32, i32) {
    %c0_i32 = arith.constant 0 : i32
    %c0_i32_0 = arith.constant 0 : i32
    %c0_i32_1 = arith.constant 0 : i32
    return %c0_i32, %c0_i32_0 : i32, i32
  }
  func.func @transform_11(%arg0: i32) -> (i32, i32) {
    %c0_i32 = arith.constant 0 : i32
    %c0_i32_0 = arith.constant 0 : i32
    %c0_i32_1 = arith.constant 0 : i32
    return %c0_i32, %c0_i32_0 : i32, i32
  }
  func.func @transform_12(%arg0: i32) -> (i32, i32) {
    %c0_i32 = arith.constant 0 : i32
    %c0_i32_0 = arith.constant 0 : i32
    %c0_i32_1 = arith.constant 0 : i32
    return %c0_i32, %c0_i32_0 : i32, i32
  }
  func.func @transform_13(%arg0: i32) -> (i32, i32) {
    %c0_i32 = arith.constant 0 : i32
    %c0_i32_0 = arith.constant 0 : i32
    return %arg0, %c0_i32 : i32, i32
  }
}

</mosaic_0001>

<bundles_post_ra>
// kernel: tpu_custom_call.1
= control target key start
LH: loop header
LB: loop body
LE: loop exit
PB: predicated region body
PF: predicated region fallthrough
CT: control target
= control target key end

     0   :  { %s3189_s0 = inlined_call_operand.hbm [shape: f32[16,128], index: 0, kind: input, shape index: {}]   ;;  %s3190_s1 = inlined_call_operand.hbm [shape: bf16[128,256], index: 1, kind: input, shape index: {}]   ;;  %s3191_s2 = inlined_call_operand.vmem [shape: f32[1,256], index: 2, kind: input, shape index: {}]   ;;  %s3192_s3 = inlined_call_operand.hbm [shape: bf16[256,256], index: 3, kind: input, shape index: {}]   ;;  %s3193_s4 = inlined_call_operand.vmem [shape: f32[1,256], index: 4, kind: input, shape index: {}]   ;;  %s3194_s5 = inlined_call_operand.hbm [shape: bf16[256,256], index: 5, kind: input, shape index: {}]   ;;  %s3195_s6 = inlined_call_operand.vmem [shape: f32[1,256], index: 6, kind: input, shape index: {}]   ;;  %s3196_s7 = inlined_call_operand.hbm [shape: bf16[256,256], index: 7, kind: input, shape index: {}]   ;;  %s3197_s8 = inlined_call_operand.vmem [shape: f32[1,256], index: 8, kind: input, shape index: {}]   ;;  %s3198_s9 = inlined_call_operand.hbm [shape: bf16[256,256], index: 9, kind: input, shape index: {}]   ;;  %s3199_s10 = inlined_call_operand.vmem [shape: f32[1,256], index: 10, kind: input, shape index: {}]   ;;  %s3200_s11 = inlined_call_operand.hbm [shape: bf16[256,128], index: 11, kind: input, shape index: {}]   ;;  %s3201_s12 = inlined_call_operand.vmem [shape: f32[1,128], index: 12, kind: input, shape index: {}]   ;;  %s3202_s13 = inlined_call_operand.hbm [shape: f32[16,128], index: 13, kind: output, shape index: {}]  }
   0x1   :  { %3208 = sst [smem:[#allocation22_spill]] %s3190_s1 }
   0x2   :  { %3209 = sst [smem:[#allocation23_spill]] %s3192_s3 }
   0x3   :  { %3210 = sst [smem:[#allocation24_spill]] %s3194_s5 }
   0x4   :  { %3211 = sst [smem:[#allocation25_spill]] %s3196_s7 }
   0x5   :  { %3212 = sst [smem:[#allocation26_spill]] %s3198_s9 }
   0x6   :  { %3213 = sst [smem:[#allocation27_spill]] %s3200_s11 }
   0x7   :  { %18 = vsyncpa [#allocation3], 0 }
   0x8   :  { %20 = vsyncpa [#allocation3 + $0x1], 0 }
   0x9   :  { %21 = vsyncpa [#allocation6], 0 }
   0xa   :  { %22 = vsyncpa [#allocation9], 0 }
   0xb   :  { %23 = vsyncpa [#allocation12], 0 }
   0xc   :  { %24 = vsyncpa [#allocation4], 0 }
   0xd   :  { %26 = vsyncpa [#allocation4 + $0x1], 0  ;;  %s2908_s25 = smov 0   ;;  %s2910_s26 = smov 0  }
   0xe   :  { %s2912_s27 = smov 0   ;;  %s2914_s28 = smov 0  }
   0xf LB: > { %3214 = sst [smem:[#allocation20_spill]] %s2819_s27  ;;  %s2825_s29 = smov [#allocation5]   ;;  %s2823_s28 = sphi %s2914_s28, %s3245_s28   ;;  %s2819_s27 = sphi %s2912_s27, %s3242_s27   ;;  %s2815_s26 = sphi %s2910_s26, %s3244_s26   ;;  %s2811_s25 = sphi %s2908_s25, %s3243_s25  }
  0x10   : > { %s353_s30 = sshll.u32 %s2825_s29, 4  ;;  %s2929_s14 = sadd.s32 4294967295, %s2823_s28   ;;  %s354_s30 = int_to_ptr.vmem [resolvable:$true] %s353_s30 }
  0x11   : > { %p2013_p0 = scmp.ge.s32.totalorder %s2823_s28, 1  ;;  %p3203_p1 = scmp.eq.s32.totalorder %s2929_s14, 0 }
  0x12   : > { %p341_p2 = scmp.lt.s32.totalorder %s2823_s28, 3  ;;  %s2826_s16 = smov [#allocation8]  }
  0x13   : > { %s385_s17 = sshll.u32 %s2826_s16, 4  ;;  %s2827_s19 = smov [#allocation11]   ;;  %s2947_s17 = int_to_ptr.vmem [resolvable:$true] %s385_s17 }
  0x14   : > { %p2934_p3 = pnand %p2013_p0, %p341_p2  ;;  %s417_s20 = sshll.u32 %s2827_s19, 4  ;;  %s2949_s20 = int_to_ptr.vmem [resolvable:$true] %s417_s20 }
  0x15   : > { %s2574_s22 = scalar_lea.vmem %s354_s30, 2048  ;;  %p2582_p11 = scmp.lt.s32.totalorder %s354_s30, %s354_s30 }
  0x16   : > { %s3215_s15 = scalar_select %p2934_p3, 1, 0 }
  0x17   : > { %p2247_p5 = pneg %p2934_p3  ;;  %p2575_p8 = scmp.ne.s32.totalorder %s354_s30, %s2574_s22 }
  0x18   : > { %p2583_p12 = scmp.lt.s32.totalorder %s2574_s22, %s2574_s22 }
  0x19   : > { %p2943_p6 = pnand %p2247_p5, %p3203_p1 }
  0x1a   : > { %p2584_p13 = por %p2583_p12, %p2582_p11 }
  0x1b   : > { %p2953_p7 = pneg %p2943_p6 }
  0x1d   : > { %p2577_p9 = pnand %p2575_p8, %p2953_p7 }
  0x1f   : > { %p2578_p10 = pneg %p2577_p9 }
  0x21   : > { %p2585_p0 = pnand %p2584_p13, %p2578_p10 }
  0x23   : > { %2588 = shalt.err (!%p2585_p0)
}
  0x24   : > { %s2828_s23 = smov 128   ;;  %s2829_s24 = smov 8  }
  0x25   : > { %s3218_s1 = sld [smem:[#allocation22_spill]]  ;;  %s2600_s19 = scalar_lea.vmem %s2947_s17, 4096 }
  0x26   : > { %p2601_p2 = scmp.ne.s32.totalorder %s2947_s17, %s2600_s19  ;;  %p2608_p9 = scmp.lt.s32.totalorder %s2947_s17, %s2947_s17 }
  0x27   : > { %p2609_p10 = scmp.lt.s32.totalorder %s2600_s19, %s2600_s19 }
  0x28   : > { %p2603_p5 = pnand %p2601_p2, %p2953_p7 }
  0x29   : > { %p2610_p11 = por %p2609_p10, %p2608_p9 }
  0x2a   : > { %p2604_p8 = pneg %p2603_p5 }
  0x2b   : > { %2250 = dma.hbm_to_vmem [thread:$0]  (!%p2943_p6), %s3218_s1, 2048, %s354_s30, [#allocation6], %s2828_s23, %s2828_s23, %s2829_s24  }
  0x2c   : > { %p2611_p12 = pnand %p2610_p11, %p2604_p8 }
  0x2e   : > { %2614 = shalt.err (!%p2611_p12)
}
  0x2f   : > { %s3219_s5 = sld [smem:[#allocation24_spill]]  ;;  %s2626_s30 = scalar_lea.vmem %s2949_s20, 4096 }
  0x30   : > { %p2627_p13 = scmp.ne.s32.totalorder %s2949_s20, %s2626_s30  ;;  %p2634_p5 = scmp.lt.s32.totalorder %s2949_s20, %s2949_s20 }
  0x31   : > { %p2635_p8 = scmp.lt.s32.totalorder %s2626_s30, %s2626_s30 }
  0x32   : > { %p2629_p0 = pnand %p2627_p13, %p2953_p7 }
  0x33   : > { %p2636_p9 = por %p2635_p8, %p2634_p5 }
  0x34   : > { %p2630_p2 = pneg %p2629_p0 }
  0x35   : > { %2256 = dma.hbm_to_vmem [thread:$0]  (!%p2943_p6), %s3219_s5, 4096, %s2947_s17, [#allocation9], %s2828_s23, %s2828_s23, %s2829_s24  }
  0x36   : > { %p2637_p10 = pnand %p2636_p9, %p2630_p2 }
  0x38   : > { %2640 = shalt.err (!%p2637_p10)
}
  0x39   : > { %s3220_s9 = sld [smem:[#allocation26_spill]]  ;;  %s2830_s17 = smov [#allocation7]  }
  0x3a   : > { %s369_s22 = sshll.u32 %s2830_s17, 4  ;;  %s2831_s29 = smov [#allocation10]   ;;  %s370_s22 = int_to_ptr.vmem [resolvable:$true] %s369_s22 }
  0x3b   : > { %s401_s1 = sshll.u32 %s2831_s29, 4  ;;  %s2652_s30 = scalar_lea.vmem %s370_s22, 4096  ;;  %s402_s1 = int_to_ptr.vmem [resolvable:$true] %s401_s1 }
  0x3c   : > { %p2653_p11 = scmp.ne.s32.totalorder %s370_s22, %s2652_s30  ;;  %p2660_p0 = scmp.lt.s32.totalorder %s370_s22, %s370_s22 }
  0x3d   : > { %p2661_p2 = scmp.lt.s32.totalorder %s2652_s30, %s2652_s30 }
  0x3e   : > { %p2655_p12 = pnand %p2653_p11, %p2953_p7 }
  0x3f   : > { %2262 = dma.hbm_to_vmem [thread:$0]  (!%p2943_p6), %s3220_s9, 4096, %s2949_s20, [#allocation12], %s2828_s23, %s2828_s23, %s2829_s24  }
  0x40   : > { %p2656_p13 = pneg %p2655_p12  ;;  %p2662_p5 = por %p2661_p2, %p2660_p0 }
  0x42   : > { %p2663_p8 = pnand %p2662_p5, %p2656_p13 }
  0x44   : > { %2666 = shalt.err (!%p2663_p8)
}
  0x45   : > { %s3221_s3 = sld [smem:[#allocation23_spill]]  ;;  %s2678_s19 = scalar_lea.vmem %s402_s1, 4096 }
  0x46   : > { %p2679_p9 = scmp.ne.s32.totalorder %s402_s1, %s2678_s19  ;;  %p2686_p12 = scmp.lt.s32.totalorder %s402_s1, %s402_s1 }
  0x47   : > { %p2687_p0 = scmp.lt.s32.totalorder %s2678_s19, %s2678_s19 }
  0x48   : > { %p2681_p10 = pnand %p2679_p9, %p2953_p7 }
  0x49   : > { %p2688_p13 = por %p2687_p0, %p2686_p12 }
  0x4a   : > { %p2682_p11 = pneg %p2681_p10 }
  0x4b   : > { %2253 = dma.hbm_to_vmem [thread:$0]  (!%p2943_p6), %s3221_s3, 4096, %s370_s22, [#allocation6], %s2828_s23, %s2828_s23, %s2829_s24  }
  0x4c   : > { %p2689_p2 = pnand %p2688_p13, %p2682_p11 }
  0x4e   : > { %2692 = shalt.err (!%p2689_p2)
}
  0x4f   : > { %s3222_s7 = sld [smem:[#allocation25_spill]]  ;;  %s2832_s22 = smov [#allocation13]  }
  0x50   : > { %s433_s30 = sshll.u32 %s2832_s22, 4  ;;  %s434_s30 = int_to_ptr.vmem [resolvable:$true] %s433_s30 }
  0x51   : > { %s2704_s20 = scalar_lea.vmem %s434_s30, 2048  ;;  %p2712_p10 = scmp.lt.s32.totalorder %s434_s30, %s434_s30 }
  0x52   : > { %p2705_p5 = scmp.ne.s32.totalorder %s434_s30, %s2704_s20  ;;  %p2713_p11 = scmp.lt.s32.totalorder %s2704_s20, %s2704_s20 }
  0x54   : > { %p2707_p8 = pnand %p2705_p5, %p2953_p7  ;;  %p2714_p12 = por %p2713_p11, %p2712_p10 }
  0x55   : > { %2259 = dma.hbm_to_vmem [thread:$0]  (!%p2943_p6), %s3222_s7, 4096, %s402_s1, [#allocation9], %s2828_s23, %s2828_s23, %s2829_s24  }
  0x56   : > { %p2708_p9 = pneg %p2707_p8 }
  0x58   : > { %p2715_p0 = pnand %p2714_p12, %p2708_p9 }
  0x5a   : > { %2718 = shalt.err (!%p2715_p0)
}
  0x5b   : > { %s2833_s16 = smov 64   ;;  %s2834_s1 = smov 4  }
  0x5c   : > { %s3223_s11 = sld [smem:[#allocation27_spill]]  ;;  %s2012_s24 = sadd.s32 4294967294, %s2823_s28  }
  0x5d   : > { %s3026_s19 = sadd.s32 1, %s2823_s28   ;;  %s39_s29 = sadd.s32 1, %s2819_s27 }
  0x5e   : > { %s36_s17 = ssub.s32 %s2823_s28, %s3026_s19  ;;  %p46_p13 = scmp.ne.s32.totalorder %s2819_s27, %s2815_s26 }
  0x5f   : > { %p37_p7 = scmp.eq.s32.totalorder %s36_s17, 0  ;;  %p47_p2 = scmp.eq.s32.totalorder %s2823_s28, 0 }
  0x60   : > { %p52_p5 = scmp.ne.s32.totalorder %s2815_s26, %s2811_s25  ;;  %p328_p9 = scmp.eq.s32.totalorder %s2929_s14, 1 }
  0x61   : > { %s3037_s22 = scalar_select %p37_p7, %s2819_s27, %s39_s29  }
  0x62   : > { %2265 = dma.hbm_to_vmem [thread:$0]  (!%p2943_p6), %s3223_s11, 2048, %s434_s30, [#allocation12], %s2833_s16, %s2833_s16, %s2834_s1  }
  0x63   : > { %3224 = sst [smem:[#allocation21_spill]] %s3037_s22  ;;  %p3039_p8 = por %p47_p2, %p46_p13 }
  0x64   : > { %p3045_p6 = por %p3203_p1, %p52_p5  ;;  %p334_p10 = scmp.eq.s32.totalorder %s2012_s24, 1 }
  0x65   : > { %p2280_p11 = scmp.lt.s32.totalorder %s2823_s28, 2  ;;  %s450_s20 = sand.u32 1, %s2819_s27  }
  0x66   : > { %s3226_s30 = scalar_select %p3045_p6, 1, 0 }
  0x67   : > { %p3052_p12 = por %p328_p9, %p46_p13  ;;  %p3056_p0 = por %p334_p10, %p52_p5 }
  0x68   : > { %s2021_s21 = sshll.u32 %s450_s20, 3  ;;  %s2022_s23 = sshll.u32 %s2823_s28, 7 }
  0x69   : > { %s3227_s16 = scalar_select %p3052_p12, 1, 0 }
  0x6a   : > { %s3228_s1 = scalar_select %p3056_p0, 1, 0 }
  0x6b   : > { %s3064_s3 = scalar_lea.hbm %s3189_s0, %s2022_s23  ;;  %s454_s24 = scalar_lea.vmem [#allocation2], %s2021_s21 }
  0x6c   : > { %s461_s5 = sshll.u32 %s454_s24, 4  ;;  %p3068_p7 = pnand %p2280_p11, %p3039_p8  ;;  %s462_s5 = int_to_ptr.vmem [resolvable:$true] %s461_s5 }
  0x6d   : > { %s451_s9 = scalar_lea.sflag [#allocation3], %s450_s20  ;;  %s2719_s11 = scalar_lea.hbm %s3064_s3, 128 }
  0x6e   : > { %p2720_p13 = scmp.ne.s32.totalorder %s3064_s3, %s2719_s11  ;;  %p2721_p2 = pneg %p3068_p7 }
  0x6f   : > { %s2724_s29 = scalar_lea.hbm %s3189_s0, 256  ;;  %p2725_p10 = scmp.lt.s32.totalorder %s3064_s3, %s3189_s0 }
  0x70   : > { %p2722_p5 = pnand %p2721_p2, %p2720_p13  ;;  %p2726_p8 = scmp.lt.s32.totalorder %s2724_s29, %s2719_s11 }
  0x72   : > { %p2723_p9 = pneg %p2722_p5  ;;  %p2727_p11 = por %p2726_p8, %p2725_p10 }
  0x74   : > { %p2728_p4 = pnand %p2727_p11, %p2723_p9 }
  0x76   : > { %2731 = shalt.err (!%p2728_p4)
}
  0x77   : > { %s2732_s18 = scalar_lea.vmem %s462_s5, 128  ;;  %s2835_s20 = smov [#allocation2]  }
  0x78   : > { %p2733_p1 = scmp.ne.s32.totalorder %s462_s5, %s2732_s18  ;;  %s2737_s22 = sshll.u32 %s2835_s20, 4  ;;  %s2738_s22 = int_to_ptr.vmem [resolvable:$false] %s2737_s22 }
  0x79   : > { %s2739_s27 = scalar_lea.vmem %s2738_s22, 256  ;;  %p2740_p13 = scmp.lt.s32.totalorder %s462_s5, %s2738_s22 }
  0x7a   : > { %p2735_p0 = pnand %p2733_p1, %p2721_p2  ;;  %p2741_p5 = scmp.lt.s32.totalorder %s2739_s27, %s2732_s18 }
  0x7c   : > { %p2736_p12 = pneg %p2735_p0  ;;  %p2742_p6 = por %p2741_p5, %p2740_p13 }
  0x7e   : > { %p2743_p3 = pnand %p2742_p6, %p2736_p12 }
  0x80   : > { %2746 = shalt.err (!%p2743_p3)
}
  0x81   : > { %2269 = dma.hbm_to_vmem [thread:$0]  (!%p3068_p7), %s3064_s3, 128, %s462_s5, %s451_s9  }
  0x82   : > { %p3230_p9 = scmp.ne.s32.totalorder %s3215_s15, 0 }
  0x83   : > { %s3089_s11 = sand.u32 (!%p3230_p9), 1, %s2815_s26   ;;  %p3231_p1 = scmp.ne.s32.totalorder (!%p3230_p9), %s3226_s30, 0 }
  0x84   : > { %470 = sbr.rel (%p3230_p9) target bundleno = 1402 (0x57a), region = 72  ;;  %s2024_s23 = sshll.u32 (!%p3230_p9), %s3089_s11, 3 }
  0x85   : > { %s473_s22 = scalar_lea.sflag (!%p3230_p9), [#allocation3], %s3089_s11  ;;  %s3095_s27 = scalar_lea.vmem (!%p3230_p9), [#allocation2], %s2024_s23 }
  0x89   : > { %2790 = dma.done.wait (%p3231_p1), %s473_s22, 128  }
  0x8a   : > { %2792 = vsyncadd (%p3231_p1), %s473_s22, 4294967168  ;;  %p3232_p3 = scmp.eq.s32.totalorder %s2929_s14, 0 }
  0x8c   : > { %2794 = dma.done.wait (%p3232_p3), [#allocation6], 6144   ;;  %p3233_p4 = pmov %p3232_p3 }
  0x8d   : > { %p3234_p6 = pmov %p3232_p3 }
  0x8e   : > { %2796 = vsyncadd (%p3233_p4), [#allocation6], 4294961152 }
  0x8f   : > { %2798 = dma.done.wait (%p3234_p6), [#allocation9], 8192   ;;  %p3235_p12 = pmov %p3232_p3 }
  0x90   : > { %p3236_p0 = pmov %p3232_p3 }
  0x91   : > { %2800 = vsyncadd (%p3235_p12), [#allocation9], 4294959104 }
  0x92   : > { %2802 = dma.done.wait (%p3236_p0), [#allocation12], 6144   ;;  %p3237_p7 = pmov %p3236_p0 }
  0x93   : > { %v2836_v0 = vmov 0   ;;  %v2331_v1 = vld [vmem:[#allocation5 + $0x74] ss:$8 sps:$4 sm:$0xff]   ;;  %v2333_v2 = vld [vmem:[#allocation5 + $0x70] ss:$8 sps:$4 sm:$0xff]   ;;  %s2194_s22 = sshll.u32 %s2929_s14, 7 }
  0x94   : > { %2804 = vsyncadd (%p3237_p7), [#allocation12], 4294961152  ;;  %686 = vmatprep.mubr.bf16.mxu0 %v2836_v0  ;;  %654 = vmatprep.subr.bf16.mxu0 %v2331_v1  ;;  %v2334_v3 = vld [vmem:[#allocation5 + $0x64] ss:$8 sps:$4 sm:$0xff]   ;;  %v2336_v4 = vld [vmem:[#allocation5 + $0x60] ss:$8 sps:$4 sm:$0xff]   ;;  %s3152_s9 = scalar_lea.hbm %s3202_s13, %s2194_s22 }
  0x95   : > { %655 = vmatpush1.bf16.msra.mxu0 %v2333_v2  ;;  %v2337_v5 = vld [vmem:[#allocation5 + $0x54] ss:$8 sps:$4 sm:$0xff]   ;;  %v2339_v6 = vld [vmem:[#allocation5 + $0x50] ss:$8 sps:$4 sm:$0xff]   ;;  %v2340_v7 = vld [vmem:[#allocation5 + $0x44] ss:$8 sps:$4 sm:$0xff]  }
  0x96   : > { %656 = vmatprep.subr.bf16.mxu0 %v2334_v3  ;;  %v2342_v8 = vld [vmem:[#allocation5 + $0x40] ss:$8 sps:$4 sm:$0xff]   ;;  %v2343_v9 = vld [vmem:[#allocation5 + $0x34] ss:$8 sps:$4 sm:$0xff]   ;;  %v2357_v11 = vld [vmem:[#allocation7 + $0x70] ss:$8 sps:$4 sm:$0xff]  }
  0x97   : > { %v2355_v10 = vld [vmem:[#allocation7 + $0x74] ss:$8 sps:$4 sm:$0xff]   ;;  %v2358_v12 = vld [vmem:[#allocation7 + $0x64] ss:$8 sps:$4 sm:$0xff]   ;;  %v2345_v13 = vld [vmem:[#allocation5 + $0x30] ss:$8 sps:$4 sm:$0xff]  }
  0x98   : > { %903 = vmatprep.subr.bf16.mxu1 %v2355_v10  ;;  %v2360_v14 = vld [vmem:[#allocation7 + $0x60] ss:$8 sps:$4 sm:$0xff]   ;;  %v2361_v15 = vld [vmem:[#allocation7 + $0x54] ss:$8 sps:$4 sm:$0xff]   ;;  %v2346_v16 = vld [vmem:[#allocation5 + $0x24] ss:$8 sps:$4 sm:$0xff]  }
  0x99   : > { %657 = vmatpush1.bf16.msra.mxu0 %v2336_v4  ;;  %904 = vmatpush1.bf16.msra.mxu1 %v2357_v11  ;;  %v2348_v17 = vld [vmem:[#allocation5 + $0x20] ss:$8 sps:$4 sm:$0xff]   ;;  %v2363_v18 = vld [vmem:[#allocation7 + $0x50] ss:$8 sps:$4 sm:$0xff]   ;;  %v2364_v19 = vld [vmem:[#allocation7 + $0x44] ss:$8 sps:$4 sm:$0xff]  }
  0x9a   : > { %658 = vmatprep.subr.bf16.mxu0 %v2337_v5  ;;  %905 = vmatprep.subr.bf16.mxu1 %v2358_v12  ;;  %v2349_v20 = vld [vmem:[#allocation5 + $0x14] ss:$8 sps:$4 sm:$0xff]   ;;  %v2351_v21 = vld [vmem:[#allocation5 + $0x10] ss:$8 sps:$4 sm:$0xff]   ;;  %v2366_v22 = vld [vmem:[#allocation7 + $0x40] ss:$8 sps:$4 sm:$0xff]  }
  0x9b   : > { %v2367_v23 = vld [vmem:[#allocation7 + $0x34] ss:$8 sps:$4 sm:$0xff]   ;;  %v2352_v24 = vld [vmem:[#allocation5 + $0x4] ss:$8 sps:$4 sm:$0xff]   ;;  %v2354_v25 = vld [vmem:[#allocation5] ss:$8 sps:$4 sm:$0xff]  }
  0x9c   : > { %v544_v26 = vld [vmem:[%s3095_s27] sm:$0xff]  ;;  %v2370_v28 = vld [vmem:[#allocation7 + $0x24] ss:$8 sps:$4 sm:$0xff]   ;;  %v2372_v29 = vld [vmem:[#allocation7 + $0x20] ss:$8 sps:$4 sm:$0xff]   ;;  %s542_s27 = scalar_lea.vmem [#allocation14], %s2024_s23 }
  0x9d   : > { %659 = vmatpush1.bf16.msra.mxu0 %v2339_v6  ;;  %906 = vmatpush1.bf16.msra.mxu1 %v2360_v14  ;;  %v2369_v27 = vld [vmem:[#allocation7 + $0x30] ss:$8 sps:$4 sm:$0xff]   ;;  %v2373_v30 = vld [vmem:[#allocation7 + $0x14] ss:$8 sps:$4 sm:$0xff]   ;;  %v545_v31 = vpack.c.bf16 %v544_v26, %v544_v26  ;;  %v2376_v33 = vld [vmem:[#allocation7 + $0x4] ss:$8 sps:$4 sm:$0xff]  }
  0x9e   : > { %660 = vmatprep.subr.bf16.mxu0 %v2340_v7  ;;  %907 = vmatprep.subr.bf16.mxu1 %v2361_v15  ;;  %v2375_v32 = vld [vmem:[#allocation7 + $0x10] ss:$8 sps:$4 sm:$0xff]   ;;  %v2378_v34 = vld [vmem:[#allocation7] ss:$8 sps:$4 sm:$0xff]   ;;  %v2379_v35 = vld [vmem:[#allocation7 + $0xf4] ss:$8 sps:$4 sm:$0xff]   ;;  %v564_v15 = vlaneseq }
  0x9f   : > { %v2381_v36 = vld [vmem:[#allocation7 + $0xf0] ss:$8 sps:$4 sm:$0xff]   ;;  %v2382_v37 = vld [vmem:[#allocation7 + $0xe4] ss:$8 sps:$4 sm:$0xff]   ;;  %v2384_v38 = vld [vmem:[#allocation7 + $0xe0] ss:$8 sps:$4 sm:$0xff]  }
  0xa0   : > { %v2385_v39 = vld [vmem:[#allocation7 + $0xd4] ss:$8 sps:$4 sm:$0xff]   ;;  %v2387_v40 = vld [vmem:[#allocation7 + $0xd0] ss:$8 sps:$4 sm:$0xff]   ;;  %v2388_v41 = vld [vmem:[#allocation7 + $0xc4] ss:$8 sps:$4 sm:$0xff]  }
  0xa1   : > { %661 = vmatpush1.bf16.msra.mxu0 %v2342_v8  ;;  %908 = vmatpush1.bf16.msra.mxu1 %v2363_v18  ;;  %v2390_v42 = vld [vmem:[#allocation7 + $0xc0] ss:$8 sps:$4 sm:$0xff]   ;;  %v2391_v43 = vld [vmem:[#allocation7 + $0xb4] ss:$8 sps:$4 sm:$0xff]   ;;  %v2393_v44 = vld [vmem:[#allocation7 + $0xb0] ss:$8 sps:$4 sm:$0xff]  }
  0xa2   : > { %662 = vmatprep.subr.bf16.mxu0 %v2343_v9  ;;  %909 = vmatprep.subr.bf16.mxu1 %v2364_v19  ;;  %v2394_v45 = vld [vmem:[#allocation7 + $0xa4] ss:$8 sps:$4 sm:$0xff]   ;;  %v2396_v46 = vld [vmem:[#allocation7 + $0xa0] ss:$8 sps:$4 sm:$0xff]   ;;  %v2397_v47 = vld [vmem:[#allocation7 + $0x94] ss:$8 sps:$4 sm:$0xff]  }
  0xa3   : > { %v2399_v48 = vld [vmem:[#allocation7 + $0x90] ss:$8 sps:$4 sm:$0xff]   ;;  %v2400_v49 = vld [vmem:[#allocation7 + $0x84] ss:$8 sps:$4 sm:$0xff]   ;;  %v2402_v50 = vld [vmem:[#allocation7 + $0x80] ss:$8 sps:$4 sm:$0xff]  }
  0xa4   : > { %v2403_v51 = vld [vmem:[#allocation8 + $0x70] ss:$8 sps:$4 sm:$0xff]   ;;  %v2405_v52 = vld [vmem:[#allocation8 + $0x74] ss:$8 sps:$4 sm:$0xff]   ;;  %v2408_v53 = vld [vmem:[#allocation8 + $0x64] ss:$8 sps:$4 sm:$0xff]  }
  0xa5   : > { %663 = vmatpush1.bf16.msra.mxu0 %v2345_v13  ;;  %910 = vmatpush1.bf16.msra.mxu1 %v2366_v22  ;;  %v2406_v54 = vld [vmem:[#allocation8 + $0x60] ss:$8 sps:$4 sm:$0xff]   ;;  %v2411_v55 = vld [vmem:[#allocation8 + $0x54] ss:$8 sps:$4 sm:$0xff]   ;;  %v2409_v56 = vld [vmem:[#allocation8 + $0x50] ss:$8 sps:$4 sm:$0xff]  }
  0xa6   : > { %664 = vmatprep.subr.bf16.mxu0 %v2346_v16  ;;  %911 = vmatprep.subr.bf16.mxu1 %v2367_v23  ;;  %v2414_v57 = vld [vmem:[#allocation8 + $0x44] ss:$8 sps:$4 sm:$0xff]   ;;  %v2412_v58 = vld [vmem:[#allocation8 + $0x40] ss:$8 sps:$4 sm:$0xff]   ;;  %v2417_v59 = vld [vmem:[#allocation8 + $0x34] ss:$8 sps:$4 sm:$0xff]  }
  0xa7   : > { %v2415_v60 = vld [vmem:[#allocation8 + $0x30] ss:$8 sps:$4 sm:$0xff]   ;;  %v2420_v61 = vld [vmem:[#allocation8 + $0x24] ss:$8 sps:$4 sm:$0xff]   ;;  %v2418_v62 = vld [vmem:[#allocation8 + $0x20] ss:$8 sps:$4 sm:$0xff]  }
  0xa8   : > { %v2423_v63 = vld [vmem:[#allocation8 + $0x14] ss:$8 sps:$4 sm:$0xff]   ;;  %v2421_v0 = vld [vmem:[#allocation8 + $0x10] ss:$8 sps:$4 sm:$0xff]   ;;  %v2426_v1 = vld [vmem:[#allocation8 + $0x4] ss:$8 sps:$4 sm:$0xff]  }
  0xa9   : > { %665 = vmatpush1.bf16.msra.mxu0 %v2348_v17  ;;  %912 = vmatpush1.bf16.msra.mxu1 %v2369_v27  ;;  %v2424_v2 = vld [vmem:[#allocation8] ss:$8 sps:$4 sm:$0xff]   ;;  %v2429_v3 = vld [vmem:[#allocation8 + $0xf4] ss:$8 sps:$4 sm:$0xff]   ;;  %v2427_v4 = vld [vmem:[#allocation8 + $0xf0] ss:$8 sps:$4 sm:$0xff]  }
  0xaa   : > { %666 = vmatprep.subr.bf16.mxu0 %v2349_v20  ;;  %913 = vmatprep.subr.bf16.mxu1 %v2370_v28  ;;  %v2432_v5 = vld [vmem:[#allocation8 + $0xe4] ss:$8 sps:$4 sm:$0xff]   ;;  %v2430_v6 = vld [vmem:[#allocation8 + $0xe0] ss:$8 sps:$4 sm:$0xff]   ;;  %v2435_v7 = vld [vmem:[#allocation8 + $0xd4] ss:$8 sps:$4 sm:$0xff]  }
  0xab   : > { %v2433_v8 = vld [vmem:[#allocation8 + $0xd0] ss:$8 sps:$4 sm:$0xff]   ;;  %v2438_v9 = vld [vmem:[#allocation8 + $0xc4] ss:$8 sps:$4 sm:$0xff]   ;;  %v2436_v10 = vld [vmem:[#allocation8 + $0xc0] ss:$8 sps:$4 sm:$0xff]  }
  0xac   : > { %v2441_v11 = vld [vmem:[#allocation8 + $0xb4] ss:$8 sps:$4 sm:$0xff]   ;;  %v2439_v12 = vld [vmem:[#allocation8 + $0xb0] ss:$8 sps:$4 sm:$0xff]   ;;  %v2444_v13 = vld [vmem:[#allocation8 + $0xa4] ss:$8 sps:$4 sm:$0xff]  }
  0xad   : > { %667 = vmatpush1.bf16.msra.mxu0 %v2351_v21  ;;  %914 = vmatpush1.bf16.msra.mxu1 %v2372_v29  ;;  %v2442_v14 = vld [vmem:[#allocation8 + $0xa0] ss:$8 sps:$4 sm:$0xff]   ;;  %v565_v16 = vshrl.u32 %v564_v15, 7  ;;  %v562_v18 = vld [vmem:[%s3191_s2] sm:$0x3]  ;;  %s1885_s3 = sshll.u32 %s542_s27, 4  ;;  %s1886_s3 = int_to_ptr.vmem [resolvable:$true] %s1885_s3 }
  0xae   : > { %668 = vmatprep.subr.bf16.mxu0 %v2352_v24  ;;  %915 = vmatprep.subr.bf16.mxu1 %v2373_v30  ;;  %v2498_v15 = vld [vmem:[#allocation10 + $0x84] ss:$8 sps:$4 sm:$0xff]   ;;  %s1872_s15 = scalar_lea.sflag [#allocation4], %s3089_s11  ;;  %s2747_s30 = scalar_lea.vmem %s1886_s3, 128 }
  0xaf   : > { %v3114_v17 = vsub.s32 0, %v565_v16  ;;  %v3119_v19 = vsub.s32 1, %v565_v16  ;;  %v2496_v16 = vld [vmem:[#allocation10 + $0x80] ss:$8 sps:$4 sm:$0xff]   ;;  %p2748_p2 = scmp.ne.s32.totalorder %s1886_s3, %s2747_s30  ;;  %p3238_p10 = scmp.ne.s32.totalorder %s3227_s16, 0 }
  0xb0   : > { %s2837_s14 = smov [#allocation14]  }
  0xb1   : > { %669 = vmatpush1.bf16.msra.mxu0 %v2354_v25  ;;  %916 = vmatpush1.bf16.msra.mxu1 %v2375_v32  ;;  %v567_v20 = vrot.slane %v562_v18, %v3114_v17  ;;  %v571_v21 = vrot.slane %v562_v18, %v3119_v19  ;;  %v2447_v32 = vld [vmem:[#allocation8 + $0x94] ss:$8 sps:$4 sm:$0xff]   ;;  %v2499_v18 = vld [vmem:[#allocation11 + $0x70] ss:$8 sps:$4 sm:$0xff]   ;;  %p2749_p8 = pnand %p2748_p2, %p3238_p10  ;;  %s2751_s23 = sshll.u32 %s2837_s14, 4  ;;  %s2752_s23 = int_to_ptr.vmem [resolvable:$false] %s2751_s23 }
  0xb2   : > { %917 = vmatprep.subr.bf16.mxu1 %v2376_v33  ;;  %1152 = vmatprep.subr.bf16.mxu0 %v2405_v52  ;;  %v2445_v33 = vld [vmem:[#allocation8 + $0x90] ss:$8 sps:$4 sm:$0xff]   ;;  %v2477_v52 = vld [vmem:[#allocation10 + $0xf4] ss:$8 sps:$4 sm:$0xff]   ;;  %s2753_s17 = scalar_lea.vmem %s2752_s23, 256  ;;  %p2754_p13 = scmp.lt.s32.totalorder %s1886_s3, %s2752_s23 }
  0xb3   : > { %p2750_p11 = pneg %p2749_p8  ;;  %p2755_p5 = scmp.lt.s32.totalorder %s2753_s17, %s2747_s30 }
  0xb4   : > { %687 = vmatmul.mubr.bf16.vlgmr.msra.gmra.mxu0 %v545_v31 }
  0xb5   : > { %918 = vmatpush1.bf16.msra.mxu1 %v2378_v34  ;;  %1153 = vmatpush1.bf16.msra.mxu0 %v2403_v51  ;;  %v2450_v34 = vld [vmem:[#allocation8 + $0x84] ss:$8 sps:$4 sm:$0xff]   ;;  %v2472_v51 = vld [vmem:[#allocation10] ss:$8 sps:$4 sm:$0xff]   ;;  %p2756_p9 = por %p2755_p5, %p2754_p13 }
  0xb6   : > { %919 = vmatprep.subr.bf16.mxu1 %v2379_v35  ;;  %1154 = vmatprep.subr.bf16.mxu0 %v2408_v53  ;;  %v2448_v35 = vld [vmem:[#allocation8 + $0x80] ss:$8 sps:$4 sm:$0xff]   ;;  %v2475_v53 = vld [vmem:[#allocation10 + $0xf0] ss:$8 sps:$4 sm:$0xff]  }
  0xb7   : > { %p2757_p1 = pnand %p2756_p9, %p2750_p11 }
  0xb9   : > { %920 = vmatpush2.bf16.msra.mxu1 %v2381_v36  ;;  %1155 = vmatpush1.bf16.msra.mxu0 %v2406_v54  ;;  %v2451_v36 = vld [vmem:[#allocation10 + $0x70] ss:$8 sps:$4 sm:$0xff]   ;;  %v2480_v54 = vld [vmem:[#allocation10 + $0xe4] ss:$8 sps:$4 sm:$0xff]  }
  0xba   : > { %921 = vmatprep.subr.bf16.mxu1 %v2382_v37  ;;  %1156 = vmatprep.subr.bf16.mxu0 %v2411_v55  ;;  %v2453_v37 = vld [vmem:[#allocation10 + $0x74] ss:$8 sps:$4 sm:$0xff]   ;;  %v2478_v55 = vld [vmem:[#allocation10 + $0xe0] ss:$8 sps:$4 sm:$0xff]  }
  0xbd   : > { %922 = vmatpush2.bf16.msra.mxu1 %v2384_v38  ;;  %1157 = vmatpush1.bf16.msra.mxu0 %v2409_v56  ;;  %v2456_v38 = vld [vmem:[#allocation10 + $0x64] ss:$8 sps:$4 sm:$0xff]   ;;  %v2483_v56 = vld [vmem:[#allocation10 + $0xd4] ss:$8 sps:$4 sm:$0xff]  }
  0xbe   : > { %923 = vmatprep.subr.bf16.mxu1 %v2385_v39  ;;  %1158 = vmatprep.subr.bf16.mxu0 %v2414_v57  ;;  %v2454_v39 = vld [vmem:[#allocation10 + $0x60] ss:$8 sps:$4 sm:$0xff]   ;;  %v2481_v57 = vld [vmem:[#allocation10 + $0xd0] ss:$8 sps:$4 sm:$0xff]  }
  0xc1   : > { %924 = vmatpush2.bf16.msra.mxu1 %v2387_v40  ;;  %1159 = vmatpush1.bf16.msra.mxu0 %v2412_v58  ;;  %v2459_v40 = vld [vmem:[#allocation10 + $0x54] ss:$8 sps:$4 sm:$0xff]   ;;  %v2486_v58 = vld [vmem:[#allocation10 + $0xc4] ss:$8 sps:$4 sm:$0xff]  }
  0xc2   : > { %925 = vmatprep.subr.bf16.mxu1 %v2388_v41  ;;  %1160 = vmatprep.subr.bf16.mxu0 %v2417_v59  ;;  %v2457_v41 = vld [vmem:[#allocation10 + $0x50] ss:$8 sps:$4 sm:$0xff]   ;;  %v2484_v59 = vld [vmem:[#allocation10 + $0xc0] ss:$8 sps:$4 sm:$0xff]  }
  0xc5   : > { %926 = vmatpush2.bf16.msra.mxu1 %v2390_v42  ;;  %1161 = vmatpush1.bf16.msra.mxu0 %v2415_v60  ;;  %v2462_v42 = vld [vmem:[#allocation10 + $0x44] ss:$8 sps:$4 sm:$0xff]   ;;  %v2489_v60 = vld [vmem:[#allocation10 + $0xb4] ss:$8 sps:$4 sm:$0xff]  }
  0xc6   : > { %927 = vmatprep.subr.bf16.mxu1 %v2391_v43  ;;  %1162 = vmatprep.subr.bf16.mxu0 %v2420_v61  ;;  %v2460_v43 = vld [vmem:[#allocation10 + $0x40] ss:$8 sps:$4 sm:$0xff]   ;;  %v2487_v61 = vld [vmem:[#allocation10 + $0xb0] ss:$8 sps:$4 sm:$0xff]  }
  0xc9   : > { %928 = vmatpush2.bf16.msra.mxu1 %v2393_v44  ;;  %1163 = vmatpush1.bf16.msra.mxu0 %v2418_v62  ;;  %v2465_v44 = vld [vmem:[#allocation10 + $0x34] ss:$8 sps:$4 sm:$0xff]   ;;  %v2492_v62 = vld [vmem:[#allocation10 + $0xa4] ss:$8 sps:$4 sm:$0xff]  }
  0xca   : > { %929 = vmatprep.subr.bf16.mxu1 %v2394_v45  ;;  %1164 = vmatprep.subr.bf16.mxu0 %v2423_v63  ;;  %v2463_v45 = vld [vmem:[#allocation10 + $0x30] ss:$8 sps:$4 sm:$0xff]   ;;  %v2490_v63 = vld [vmem:[#allocation10 + $0xa0] ss:$8 sps:$4 sm:$0xff]  }
  0xcd   : > { %930 = vmatpush2.bf16.msra.mxu1 %v2396_v46  ;;  %1165 = vmatpush1.bf16.msra.mxu0 %v2421_v0  ;;  %v2468_v46 = vld [vmem:[#allocation10 + $0x24] ss:$8 sps:$4 sm:$0xff]   ;;  %v731_v0 = vld [vmem:[%s3193_s4] sm:$0x3] }
  0xce   : > { %931 = vmatprep.subr.bf16.mxu1 %v2397_v47  ;;  %1166 = vmatprep.subr.bf16.mxu0 %v2426_v1  ;;  %v2466_v47 = vld [vmem:[#allocation10 + $0x20] ss:$8 sps:$4 sm:$0xff]   ;;  %v736_v1 = vrot.slane %v731_v0, %v3114_v17 }
  0xd1   : > { %932 = vmatpush2.bf16.msra.mxu1 %v2399_v48  ;;  %1167 = vmatpush1.bf16.msra.mxu0 %v2424_v2  ;;  %v2471_v48 = vld [vmem:[#allocation10 + $0x14] ss:$8 sps:$4 sm:$0xff]   ;;  %v740_v2 = vrot.slane %v731_v0, %v3119_v19 }
  0xd2   : > { %933 = vmatprep.subr.bf16.mxu1 %v2400_v49  ;;  %1168 = vmatprep.subr.bf16.mxu0 %v2429_v3  ;;  %v2469_v49 = vld [vmem:[#allocation10 + $0x10] ss:$8 sps:$4 sm:$0xff]  }
  0xd3   : > { %v2547_v0 = vld [vmem:[#allocation13 + $0x78] sm:$0xff]  }
  0xd5   : > { %934 = vmatpush2.bf16.msra.mxu1 %v2402_v50  ;;  %1169 = vmatpush2.bf16.msra.mxu0 %v2427_v4  ;;  %v2474_v50 = vld [vmem:[#allocation10 + $0x4] ss:$8 sps:$4 sm:$0xff]  }
  0xd6   : > { %1170 = vmatprep.subr.bf16.mxu0 %v2432_v5  ;;  %1401 = vmatprep.subr.bf16.mxu1 %v2453_v37  ;;  %v2528_v37 = vld [vmem:[#allocation11 + $0xe4] ss:$8 sps:$4 sm:$0xff]  }
  0xd9   : > { %1171 = vmatpush2.bf16.msra.mxu0 %v2430_v6 }
  0xda   : > { %1172 = vmatprep.subr.bf16.mxu0 %v2435_v7 }
  0xdd   : > { %1173 = vmatpush2.bf16.msra.mxu0 %v2433_v8 }
  0xde   : > { %1174 = vmatprep.subr.bf16.mxu0 %v2438_v9 }
  0xe1   : > { %1175 = vmatpush2.bf16.msra.mxu0 %v2436_v10 }
  0xe2   : > { %1176 = vmatprep.subr.bf16.mxu0 %v2441_v11 }
  0xe5   : > { %1177 = vmatpush2.bf16.msra.mxu0 %v2439_v12 }
  0xe6   : > { %1178 = vmatprep.subr.bf16.mxu0 %v2444_v13  ;;  %v2495_v13 = vld [vmem:[#allocation10 + $0x94] ss:$8 sps:$4 sm:$0xff]  }
  0xe9   : > { %1179 = vmatpush2.bf16.msra.mxu0 %v2442_v14  ;;  %v2493_v14 = vld [vmem:[#allocation10 + $0x90] ss:$8 sps:$4 sm:$0xff]  }
  0xea   : > { %1180 = vmatprep.subr.bf16.mxu0 %v2447_v32  ;;  %v2517_v32 = vld [vmem:[#allocation11 + $0x10] ss:$8 sps:$4 sm:$0xff]  }
  0xed   : > { %1181 = vmatpush2.bf16.msra.mxu0 %v2445_v33  ;;  %v2522_v33 = vld [vmem:[#allocation11 + $0x4] ss:$8 sps:$4 sm:$0xff]  }
  0xee   : > { %1182 = vmatprep.subr.bf16.mxu0 %v2450_v34  ;;  %v2520_v34 = vld [vmem:[#allocation11] ss:$8 sps:$4 sm:$0xff]  }
  0xf1   : > { %1183 = vmatpush2.bf16.msra.mxu0 %v2448_v35  ;;  %v2525_v35 = vld [vmem:[#allocation11 + $0xf4] ss:$8 sps:$4 sm:$0xff]  }
 0x174   : > { %v688_v22 = vpop.f32.mrf.mxu0 }
 0x175   : > { %v689_v23 = vadd.f32 %v688_v22, %v567_v20  ;;  %v2501_v20 = vld [vmem:[#allocation11 + $0x74] ss:$8 sps:$4 sm:$0xff]   ;;  %v2502_v22 = vld [vmem:[#allocation11 + $0x60] ss:$8 sps:$4 sm:$0xff]  }
 0x176   : > { %v690_v24 = vpop.f32.mrf.mxu0  ;;  %1650 = vmatprep.subr.bf16.mxu0 %v2501_v20 }
 0x177   : > { %v691_v25 = vadd.f32 %v690_v24, %v571_v21  ;;  %v695_v26 = vmax.f32 %v689_v23, 0.0  ;;  %v2504_v21 = vld [vmem:[#allocation11 + $0x64] ss:$8 sps:$4 sm:$0xff]   ;;  %v2507_v23 = vld [vmem:[#allocation11 + $0x54] ss:$8 sps:$4 sm:$0xff]  }
 0x178   : > { %v692_v27 = vpop.f32.mrf.mxu0  ;;  %v2505_v24 = vld [vmem:[#allocation11 + $0x50] ss:$8 sps:$4 sm:$0xff]  }
 0x179   : > { %v696_v28 = vmax.f32 %v691_v25, 0.0  ;;  %v697_v31 = vpack.c.bf16 %v695_v26, %v695_v26  ;;  %v2510_v25 = vld [vmem:[#allocation11 + $0x44] ss:$8 sps:$4 sm:$0xff]   ;;  %v2508_v26 = vld [vmem:[#allocation11 + $0x40] ss:$8 sps:$4 sm:$0xff]  }
 0x17a   : > { %v693_v29 = vpop.f32.mrf.mxu0  ;;  %v2513_v27 = vld [vmem:[#allocation11 + $0x34] ss:$8 sps:$4 sm:$0xff]  }
 0x17b   : > { %v698_v30 = vpack.c.bf16 %v696_v28, %v696_v28  ;;  %v2511_v28 = vld [vmem:[#allocation11 + $0x30] ss:$8 sps:$4 sm:$0xff]   ;;  %v2516_v29 = vld [vmem:[#allocation11 + $0x24] ss:$8 sps:$4 sm:$0xff]  }
 0x17d   : > { %935 = vmatprep.mubr.bf16.mxu1 %v698_v30  ;;  %v2514_v30 = vld [vmem:[#allocation11 + $0x20] ss:$8 sps:$4 sm:$0xff]  }
 0x17e   : > { %936 = vmatmul.mubr.bf16.vlgmr.msra.gmra.mxu1 %v697_v31  ;;  %v2519_v31 = vld [vmem:[#allocation11 + $0x14] ss:$8 sps:$4 sm:$0xff]  }
 0x17f   : > { %1402 = vmatpush1.bf16.msra.mxu1 %v2451_v36  ;;  %v2523_v36 = vld [vmem:[#allocation11 + $0xf0] ss:$8 sps:$4 sm:$0xff]  }
 0x180   : > { %1403 = vmatprep.subr.bf16.mxu1 %v2456_v38  ;;  %v2526_v38 = vld [vmem:[#allocation11 + $0xe0] ss:$8 sps:$4 sm:$0xff]  }
 0x183   : > { %1404 = vmatpush1.bf16.msra.mxu1 %v2454_v39  ;;  %v2531_v39 = vld [vmem:[#allocation11 + $0xd4] ss:$8 sps:$4 sm:$0xff]  }
 0x184   : > { %1405 = vmatprep.subr.bf16.mxu1 %v2459_v40  ;;  %v2529_v40 = vld [vmem:[#allocation11 + $0xd0] ss:$8 sps:$4 sm:$0xff]  }
 0x187   : > { %1406 = vmatpush1.bf16.msra.mxu1 %v2457_v41  ;;  %v2534_v41 = vld [vmem:[#allocation11 + $0xc4] ss:$8 sps:$4 sm:$0xff]  }
 0x188   : > { %1407 = vmatprep.subr.bf16.mxu1 %v2462_v42  ;;  %v2532_v42 = vld [vmem:[#allocation11 + $0xc0] ss:$8 sps:$4 sm:$0xff]  }
 0x18b   : > { %1408 = vmatpush1.bf16.msra.mxu1 %v2460_v43  ;;  %v2537_v43 = vld [vmem:[#allocation11 + $0xb4] ss:$8 sps:$4 sm:$0xff]  }
 0x18c   : > { %1409 = vmatprep.subr.bf16.mxu1 %v2465_v44  ;;  %v2535_v44 = vld [vmem:[#allocation11 + $0xb0] ss:$8 sps:$4 sm:$0xff]  }
 0x18f   : > { %1410 = vmatpush1.bf16.msra.mxu1 %v2463_v45  ;;  %v2540_v45 = vld [vmem:[#allocation11 + $0xa4] ss:$8 sps:$4 sm:$0xff]  }
 0x190   : > { %1411 = vmatprep.subr.bf16.mxu1 %v2468_v46  ;;  %v2538_v46 = vld [vmem:[#allocation11 + $0xa0] ss:$8 sps:$4 sm:$0xff]  }
 0x193   : > { %1412 = vmatpush1.bf16.msra.mxu1 %v2466_v47  ;;  %v980_v47 = vld [vmem:[%s3195_s6] sm:$0x3] }
 0x194   : > { %1413 = vmatprep.subr.bf16.mxu1 %v2471_v48  ;;  %v985_v48 = vrot.slane %v980_v47, %v3114_v17 }
 0x197   : > { %1414 = vmatpush1.bf16.msra.mxu1 %v2469_v49  ;;  %v989_v49 = vrot.slane %v980_v47, %v3119_v19 }
 0x198   : > { %1415 = vmatprep.subr.bf16.mxu1 %v2474_v50 }
 0x19b   : > { %1416 = vmatpush1.bf16.msra.mxu1 %v2472_v51 }
 0x19c   : > { %1417 = vmatprep.subr.bf16.mxu1 %v2477_v52 }
 0x19f   : > { %1418 = vmatpush2.bf16.msra.mxu1 %v2475_v53 }
 0x1a0   : > { %1419 = vmatprep.subr.bf16.mxu1 %v2480_v54 }
 0x1a3   : > { %1420 = vmatpush2.bf16.msra.mxu1 %v2478_v55 }
 0x1a4   : > { %1421 = vmatprep.subr.bf16.mxu1 %v2483_v56 }
 0x1a7   : > { %1422 = vmatpush2.bf16.msra.mxu1 %v2481_v57 }
 0x1a8   : > { %1423 = vmatprep.subr.bf16.mxu1 %v2486_v58 }
 0x1ab   : > { %1424 = vmatpush2.bf16.msra.mxu1 %v2484_v59 }
 0x1ac   : > { %1425 = vmatprep.subr.bf16.mxu1 %v2489_v60  ;;  %v2543_v60 = vld [vmem:[#allocation11 + $0x94] ss:$8 sps:$4 sm:$0xff]  }
 0x1af   : > { %1426 = vmatpush2.bf16.msra.mxu1 %v2487_v61  ;;  %v2541_v61 = vld [vmem:[#allocation11 + $0x90] ss:$8 sps:$4 sm:$0xff]  }
 0x1b0   : > { %1427 = vmatprep.subr.bf16.mxu1 %v2492_v62  ;;  %v2546_v62 = vld [vmem:[#allocation11 + $0x84] ss:$8 sps:$4 sm:$0xff]  }
 0x1b3   : > { %1428 = vmatpush2.bf16.msra.mxu1 %v2490_v63  ;;  %v2544_v63 = vld [vmem:[#allocation11 + $0x80] ss:$8 sps:$4 sm:$0xff]  }
 0x1b4   : > { %1429 = vmatprep.subr.bf16.mxu1 %v2495_v13 }
 0x1b7   : > { %1430 = vmatpush2.bf16.msra.mxu1 %v2493_v14 }
 0x1b8   : > { %1431 = vmatprep.subr.bf16.mxu1 %v2498_v15 }
 0x1bb   : > { %1432 = vmatpush2.bf16.msra.mxu1 %v2496_v16 }
 0x1bc   : > { %2197 = vmatprep.subr.bf16.mxu1 %v2547_v0 }
 0x23e   : > { %v937_v3 = vpop.f32.mrf.mxu1 }
 0x23f   : > { %v938_v4 = vadd.f32 %v937_v3, %v736_v1  ;;  %v2548_v1 = vld [vmem:[#allocation13 + $0x38] sm:$0xff]   ;;  %v2550_v3 = vld [vmem:[#allocation13 + $0x30] sm:$0xff]  }
 0x240   : > { %v939_v5 = vpop.f32.mrf.mxu1 }
 0x241   : > { %v940_v6 = vadd.f32 %v939_v5, %v740_v2  ;;  %v944_v7 = vmax.f32 %v938_v4, 0.0  ;;  %v2549_v2 = vld [vmem:[#allocation13 + $0x70] sm:$0xff]   ;;  %v2551_v4 = vld [vmem:[#allocation13 + $0x68] sm:$0xff]  }
 0x242   : > { %v941_v8 = vpop.f32.mrf.mxu1  ;;  %v2552_v5 = vld [vmem:[#allocation13 + $0x28] sm:$0xff]  }
 0x243   : > { %v945_v9 = vmax.f32 %v940_v6, 0.0  ;;  %v946_v12 = vpack.c.bf16 %v944_v7, %v944_v7  ;;  %v2553_v6 = vld [vmem:[#allocation13 + $0x60] sm:$0xff]   ;;  %v2555_v8 = vld [vmem:[#allocation13 + $0x58] sm:$0xff]  }
 0x244   : > { %v942_v10 = vpop.f32.mrf.mxu1  ;;  %v2554_v7 = vld [vmem:[#allocation13 + $0x20] sm:$0xff]  }
 0x245   : > { %v947_v11 = vpack.c.bf16 %v945_v9, %v945_v9  ;;  %v2556_v9 = vld [vmem:[#allocation13 + $0x18] sm:$0xff]   ;;  %v2557_v10 = vld [vmem:[#allocation13 + $0x50] sm:$0xff]  }
 0x247   : > { %1184 = vmatprep.mubr.bf16.mxu0 %v947_v11  ;;  %v2558_v11 = vld [vmem:[#allocation13 + $0x10] sm:$0xff]  }
 0x248   : > { %1185 = vmatmul.mubr.bf16.vlgmr.msra.gmra.mxu0 %v946_v12  ;;  %v1229_v12 = vld [vmem:[%s3197_s8] sm:$0x3] }
 0x249   : > { %1651 = vmatpush1.bf16.msra.mxu0 %v2499_v18  ;;  %v1234_v13 = vrot.slane %v1229_v12, %v3114_v17  ;;  %v1238_v14 = vrot.slane %v1229_v12, %v3119_v19 }
 0x24a   : > { %1652 = vmatprep.subr.bf16.mxu0 %v2504_v21 }
 0x24d   : > { %1653 = vmatpush1.bf16.msra.mxu0 %v2502_v22 }
 0x24e   : > { %1654 = vmatprep.subr.bf16.mxu0 %v2507_v23 }
 0x251   : > { %1655 = vmatpush1.bf16.msra.mxu0 %v2505_v24 }
 0x252   : > { %1656 = vmatprep.subr.bf16.mxu0 %v2510_v25 }
 0x255   : > { %1657 = vmatpush1.bf16.msra.mxu0 %v2508_v26 }
 0x256   : > { %1658 = vmatprep.subr.bf16.mxu0 %v2513_v27  ;;  %v2559_v27 = vld [vmem:[#allocation13 + $0x48] sm:$0xff]  }
 0x259   : > { %1659 = vmatpush1.bf16.msra.mxu0 %v2511_v28  ;;  %v2560_v28 = vld [vmem:[#allocation13 + $0x8] sm:$0xff]  }
 0x25a   : > { %1660 = vmatprep.subr.bf16.mxu0 %v2516_v29  ;;  %v2561_v29 = vld [vmem:[#allocation13 + $0x40] sm:$0xff]  }
 0x25d   : > { %1661 = vmatpush1.bf16.msra.mxu0 %v2514_v30  ;;  %v2562_v30 = vld [vmem:[#allocation13] sm:$0xff]  }
 0x25e   : > { %1662 = vmatprep.subr.bf16.mxu0 %v2519_v31  ;;  %v1478_v31 = vld [vmem:[%s3199_s10] sm:$0x3] }
 0x261   : > { %1663 = vmatpush1.bf16.msra.mxu0 %v2517_v32  ;;  %v1483_v32 = vrot.slane %v1478_v31, %v3114_v17  ;;  %v2176_v17 = vld [vmem:[%s3201_s12] ss:$0 sm:$0xff] }
 0x262   : > { %1664 = vmatprep.subr.bf16.mxu0 %v2522_v33  ;;  %v1487_v33 = vrot.slane %v1478_v31, %v3119_v19 }
 0x265   : > { %1665 = vmatpush1.bf16.msra.mxu0 %v2520_v34 }
 0x266   : > { %1666 = vmatprep.subr.bf16.mxu0 %v2525_v35 }
 0x269   : > { %1667 = vmatpush2.bf16.msra.mxu0 %v2523_v36 }
 0x26a   : > { %1668 = vmatprep.subr.bf16.mxu0 %v2528_v37 }
 0x26d   : > { %1669 = vmatpush2.bf16.msra.mxu0 %v2526_v38 }
 0x26e   : > { %1670 = vmatprep.subr.bf16.mxu0 %v2531_v39 }
 0x271   : > { %1671 = vmatpush2.bf16.msra.mxu0 %v2529_v40 }
 0x272   : > { %1672 = vmatprep.subr.bf16.mxu0 %v2534_v41 }
 0x275   : > { %1673 = vmatpush2.bf16.msra.mxu0 %v2532_v42 }
 0x276   : > { %1674 = vmatprep.subr.bf16.mxu0 %v2537_v43 }
 0x279   : > { %1675 = vmatpush2.bf16.msra.mxu0 %v2535_v44 }
 0x27a   : > { %1676 = vmatprep.subr.bf16.mxu0 %v2540_v45 }
 0x27d   : > { %1677 = vmatpush2.bf16.msra.mxu0 %v2538_v46 }
 0x27e   : > { %1678 = vmatprep.subr.bf16.mxu0 %v2543_v60 }
 0x281   : > { %1679 = vmatpush2.bf16.msra.mxu0 %v2541_v61 }
 0x282   : > { %1680 = vmatprep.subr.bf16.mxu0 %v2546_v62 }
 0x285   : > { %1681 = vmatpush2.bf16.msra.mxu0 %v2544_v63 }
 0x308   : > { %v1186_v50 = vpop.f32.mrf.mxu0 }
 0x309   : > { %v1187_v51 = vadd.f32 %v1186_v50, %v985_v48 }
 0x30a   : > { %v1188_v52 = vpop.f32.mrf.mxu0 }
 0x30b   : > { %v1189_v53 = vadd.f32 %v1188_v52, %v989_v49  ;;  %v1193_v54 = vmax.f32 %v1187_v51, 0.0 }
 0x30c   : > { %v1190_v55 = vpop.f32.mrf.mxu0 }
 0x30d   : > { %v1194_v56 = vmax.f32 %v1189_v53, 0.0  ;;  %v1195_v59 = vpack.c.bf16 %v1193_v54, %v1193_v54 }
 0x30e   : > { %v1191_v57 = vpop.f32.mrf.mxu0 }
 0x30f   : > { %v1196_v58 = vpack.c.bf16 %v1194_v56, %v1194_v56 }
 0x311   : > { %1433 = vmatprep.mubr.bf16.mxu1 %v1196_v58 }
 0x312   : > { %1434 = vmatmul.mubr.bf16.vlgmr.msra.gmra.mxu1 %v1195_v59 }
 0x313   : > { %2198 = vmatpush3.bf16.msra.mxu1 %v2548_v1 }
 0x314   : > { %2199 = vmatprep.subr.bf16.mxu1 %v2549_v2 }
 0x317   : > { %2200 = vmatpush3.bf16.msra.mxu1 %v2550_v3 }
 0x318   : > { %2201 = vmatprep.subr.bf16.mxu1 %v2551_v4 }
 0x31b   : > { %2202 = vmatpush3.bf16.msra.mxu1 %v2552_v5 }
 0x31c   : > { %2203 = vmatprep.subr.bf16.mxu1 %v2553_v6 }
 0x31f   : > { %2204 = vmatpush3.bf16.msra.mxu1 %v2554_v7 }
 0x320   : > { %2205 = vmatprep.subr.bf16.mxu1 %v2555_v8 }
 0x323   : > { %2206 = vmatpush3.bf16.msra.mxu1 %v2556_v9 }
 0x324   : > { %2207 = vmatprep.subr.bf16.mxu1 %v2557_v10 }
 0x327   : > { %2208 = vmatpush3.bf16.msra.mxu1 %v2558_v11 }
 0x328   : > { %2209 = vmatprep.subr.bf16.mxu1 %v2559_v27 }
 0x32b   : > { %2210 = vmatpush3.bf16.msra.mxu1 %v2560_v28 }
 0x32c   : > { %2211 = vmatprep.subr.bf16.mxu1 %v2561_v29 }
 0x32f   : > { %2212 = vmatpush3.bf16.msra.mxu1 %v2562_v30 }
 0x3d2   : > { %v1435_v15 = vpop.f32.mrf.mxu1 }
 0x3d3   : > { %v1436_v16 = vadd.f32 %v1435_v15, %v1234_v13 }
 0x3d4   : > { %v1437_v18 = vpop.f32.mrf.mxu1 }
 0x3d5   : > { %v1438_v20 = vadd.f32 %v1437_v18, %v1238_v14  ;;  %v1442_v21 = vmax.f32 %v1436_v16, 0.0 }
 0x3d6   : > { %v1439_v22 = vpop.f32.mrf.mxu1 }
 0x3d7   : > { %v1443_v23 = vmax.f32 %v1438_v20, 0.0  ;;  %v1444_v26 = vpack.c.bf16 %v1442_v21, %v1442_v21 }
 0x3d8   : > { %v1440_v24 = vpop.f32.mrf.mxu1 }
 0x3d9   : > { %v1445_v25 = vpack.c.bf16 %v1443_v23, %v1443_v23 }
 0x3db   : > { %1682 = vmatprep.mubr.bf16.mxu0 %v1445_v25 }
 0x3dc   : > { %1683 = vmatmul.mubr.bf16.vlgmr.msra.gmra.mxu0 %v1444_v26 }
 0x49c   : > { %v1684_v34 = vpop.f32.mrf.mxu0 }
 0x49d   : > { %v1685_v35 = vadd.f32 %v1684_v34, %v1483_v32 }
 0x49e   : > { %v1686_v36 = vpop.f32.mrf.mxu0 }
 0x49f   : > { %v1687_v37 = vadd.f32 %v1686_v36, %v1487_v33  ;;  %v1691_v38 = vmax.f32 %v1685_v35, 0.0 }
 0x4a0   : > { %v1688_v39 = vpop.f32.mrf.mxu0 }
 0x4a1   : > { %v1692_v40 = vmax.f32 %v1687_v37, 0.0  ;;  %v1693_v43 = vpack.c.bf16 %v1691_v38, %v1691_v38 }
 0x4a2   : > { %v1689_v41 = vpop.f32.mrf.mxu0 }
 0x4a3   : > { %v1694_v42 = vpack.c.bf16 %v1692_v40, %v1692_v40 }
 0x4a5   : > { %1862 = vmatprep.mubr.bf16.mxu1 %v1694_v42 }
 0x4a6   : > { %1863 = vmatmul.mubr.bf16.vlgmr.msra.gmra.mxu1 %v1693_v43 }
 0x566   : > { %v2213_v44 = vpop.f32.mrf.mxu1 }
 0x568   : > { %v2214_v19 = vpop.f32.mrf.mxu1 }
 0x569   : > { %v2215_v45 = vadd.f32 %v2214_v19, %v2213_v44 }
 0x56a   : > { %v2216_v46 = vpop.f32.mrf.mxu1 }
 0x56b   : > { %v1865_v47 = vadd.f32 %v2215_v45, %v2176_v17 }
 0x56c   : > { %v2217_v48 = vpop.f32.mrf.mxu1 }
 0x56d   : > { %1870 = vst [vmem:[%s542_s27] sm:$0xff] %v1865_v47 }
 0x56e   : > { %2760 = shalt.err (!%p2757_p1)
}
 0x56f   : > { %s2761_s29 = scalar_lea.hbm %s3152_s9, 128  ;;  %s2765_s24 = scalar_lea.hbm %s3202_s13, 256 }
 0x570   : > { %p2762_p3 = scmp.ne.s32.totalorder %s3152_s9, %s2761_s29  ;;  %p2766_p12 = scmp.lt.s32.totalorder %s3152_s9, %s3202_s13 }
 0x571   : > { %p2767_p0 = scmp.lt.s32.totalorder %s2765_s24, %s2761_s29 }
 0x572   : > { %p2763_p4 = pnand %p2762_p3, %p3238_p10 }
 0x573   : > { %p2768_p7 = por %p2767_p0, %p2766_p12 }
 0x574   : > { %p2764_p6 = pneg %p2763_p4 }
 0x576   : > { %p2769_p2 = pnand %p2768_p7, %p2764_p6 }
 0x578   : > { %2772 = shalt.err (!%p2769_p2)
}
 0x579   : > { %2245 = dma.vmem_to_hbm [thread:$0]  (%p3238_p10), %s1886_s3, 128, %s3152_s9, %s1872_s15  }
 0x57a PF: > { %s1897_s22 = sand.u32 1, %s2811_s25   ;;  %p3239_p8 = scmp.ne.s32.totalorder %s3228_s1, 0 }
 0x57b   : > { %p3240_p11 = scmp.ge.s32.totalorder %s2823_s28, 2  ;;  %s1898_s27 = scalar_lea.sflag [#allocation4], %s1897_s22 }
 0x57d   : > { %p2271_p13 = pnand %p3240_p11, %p3239_p8 }
 0x57f   : > { %p2272_p5 = pneg %p2271_p13 }
 0x581   : > { %2806 = dma.done.wait (%p2272_p5), %s1898_s27, 128  }
 0x582   : > { %2808 = vsyncadd (%p2272_p5), %s1898_s27, 4294967168  ;;  %s3241_s5 = sld [smem:[#allocation20_spill]]  ;;  %p29_p9 = scmp.ge.s32.totalorder %s3026_s19, 4  }
 0x583   : > { %s3242_s27 = sld [smem:[#allocation21_spill]]  ;;  %s3243_s25 = smov %s2815_s26 }
 0x584   : > { %s3245_s28 = smov %s3026_s19  ;;  %31 = sbr.rel (!%p29_p9) target bundleno = 15 (0xf), region = 141 }
 0x588   : > { %s3244_s26 = smov %s3241_s5 }
 0x589   :  { %1903 = vsyncpa [#allocation3], 1 }
 0x58a   :  { %1905 = vsyncpa [#allocation3 + $0x1], 1 }
 0x58b   :  { %1906 = vsyncpa [#allocation6], 1 }
 0x58c   :  { %1907 = vsyncpa [#allocation9], 1 }
 0x58d   :  { %1908 = vsyncpa [#allocation12], 1 }
 0x58e   :  { %1909 = vsyncpa [#allocation4], 1 }
 0x58f   :  { %1911 = vsyncpa [#allocation4 + $0x1], 1 }

</bundles_post_ra>
